<compile_context>
chip_gen: v5e
topology: v5e:2x2
jax: 0.10.0
libtpu: 0.0.40
codegen_flags: <defaults>
</compile_context>

<pallas_src>
import jax
import jax.numpy as jnp
from jax.experimental import pallas as pl
from jax.experimental.pallas import tpu as pltpu


def _round_up(n, m):
    return ((n + m - 1) // m) * m


def malnutrition_kernel(x_ref, w1_ref, c1_ref, w2_ref, c2_ref, w3_ref, b3_ref, out_ref):
    x = x_ref[...]

    # fc1 + folded bn1 -> relu   (dropout1: eval-mode identity)
    h = jnp.dot(x, w1_ref[...], preferred_element_type=jnp.float32) + c1_ref[...]
    h = jnp.maximum(h, 0.0)

    # fc2 + folded bn2 -> relu   (dropout2: eval-mode identity)
    h = jnp.dot(h, w2_ref[...], preferred_element_type=jnp.float32) + c2_ref[...]
    h = jnp.maximum(h, 0.0)

    # fc3 (true output width C; masked stores are cheap vs. padded writeback)
    out_ref[...] = (
        jnp.dot(h, w3_ref[...], preferred_element_type=jnp.float32) + b3_ref[...]
    ).astype(out_ref.dtype)


def malnutrition_forward(x, params):
    B, F_in = x.shape
    C = params["w3"].shape[0]
    eps = 1e-5

    # --- fold BatchNorm (eval) into the linear weights / additive shift -------
    s1 = params["bn1_g"] / jnp.sqrt(params["bn1_v"] + eps)
    t1 = params["bn1_b"] - params["bn1_m"] * s1
    s2 = params["bn2_g"] / jnp.sqrt(params["bn2_v"] + eps)
    t2 = params["bn2_b"] - params["bn2_m"] * s2

    w1f = (params["w1"].T * s1[None, :]).astype(jnp.float32)   # (F_in, 256)
    c1 = (params["b1"] * s1 + t1)[None, :]                     # (1, 256)
    w2f = (params["w2"].T * s2[None, :]).astype(jnp.float32)   # (256, 128)
    c2 = (params["b2"] * s2 + t2)[None, :]                     # (1, 128)
    w3t = params["w3"].T.astype(jnp.float32)                   # (128, C)
    b3 = params["b3"][None, :]                                 # (1, C)

    # --- batch tiling (no padding of x / out) ----------------------------------
    # Big tiles amortize the ~0.35 us/step overhead; for B >= 16 ensure >= 2
    # grid steps so both TensorCores on v7x are used (grid axis is "parallel").
    TB = min(2048, _round_up(B, 8))
    if B >= 16:
        TB = min(TB, _round_up(-(-B // 2), 8))
    grid = (pl.cdiv(B, TB),)

    out = pl.pallas_call(
        malnutrition_kernel,
        out_shape=jax.ShapeDtypeStruct((B, C), jnp.float32),
        grid=grid,
        in_specs=[
            # x tile: unpadded feature dim (full-extent last axis is legal).
            pl.BlockSpec((TB, F_in), lambda i: (i, 0)),
            # Weights / shifts: constant index_map -> stay VMEM-resident.
            pl.BlockSpec((F_in, 256), lambda i: (0, 0)),
            pl.BlockSpec((1, 256), lambda i: (0, 0)),
            pl.BlockSpec((256, 128), lambda i: (0, 0)),
            pl.BlockSpec((1, 128), lambda i: (0, 0)),
            pl.BlockSpec((128, C), lambda i: (0, 0)),
            pl.BlockSpec((1, C), lambda i: (0, 0)),
        ],
        # Unpadded (TB, C) output block: masked vst beats 128-lane padding at tiny C.
        out_specs=pl.BlockSpec((TB, C), lambda i: (i, 0)),
        compiler_params=pltpu.CompilerParams(
            dimension_semantics=("parallel",),
        ),
    )(x.astype(jnp.float32), w1f, c1, w2f, c2, w3t, b3)

    # L1 regularizer over all parameters named "*weight*":
    # fc1/fc2/fc3 weights + bn1/bn2 gammas.  Batch-independent -> plain JAX.
    l1_reg = (
        jnp.sum(jnp.abs(params["w1"]))
        + jnp.sum(jnp.abs(params["w2"]))
        + jnp.sum(jnp.abs(params["w3"]))
        + jnp.sum(jnp.abs(params["bn1_g"]))
        + jnp.sum(jnp.abs(params["bn2_g"]))
    )
    return out, l1_reg


def init_params(key, input_size, num_classes):
    ks = jax.random.split(key, 10)

    def kaiming_fan_out(k, out_f, in_f):
        # matches nn.init.kaiming_normal_(mode='fan_out', nonlinearity='relu')
        std = (2.0 / out_f) ** 0.5
        return std * jax.random.normal(k, (out_f, in_f), jnp.float32)

    params = {
        "w1": kaiming_fan_out(ks[0], 256, input_size),
        "b1": jnp.zeros((256,), jnp.float32),
        "w2": kaiming_fan_out(ks[1], 128, 256),
        "b2": jnp.zeros((128,), jnp.float32),
        "w3": kaiming_fan_out(ks[2], num_classes, 128),
        "b3": jnp.zeros((num_classes,), jnp.float32),
        # BatchNorm params / running stats (deterministic, non-trivial values).
        "bn1_g": 1.0 + 0.1 * jax.random.normal(ks[3], (256,), jnp.float32),
        "bn1_b": 0.1 * jax.random.normal(ks[4], (256,), jnp.float32),
        "bn1_m": 0.05 * jax.random.normal(ks[5], (256,), jnp.float32),
        "bn1_v": 1.0 + 0.1 * jax.random.uniform(ks[6], (256,), jnp.float32),
        "bn2_g": 1.0 + 0.1 * jax.random.normal(ks[7], (128,), jnp.float32),
        "bn2_b": 0.1 * jax.random.normal(ks[8], (128,), jnp.float32),
        "bn2_m": jnp.zeros((128,), jnp.float32),
        "bn2_v": 1.0 + 0.1 * jax.random.uniform(ks[9], (128,), jnp.float32),
    }
    return params


def reference_forward(x, params):
    eps = 1e-5
    h = x @ params["w1"].T + params["b1"]
    h = (h - params["bn1_m"]) / jnp.sqrt(params["bn1_v"] + eps) * params["bn1_g"] + params["bn1_b"]
    h = jnp.maximum(h, 0.0)
    h = h @ params["w2"].T + params["b2"]
    h = (h - params["bn2_m"]) / jnp.sqrt(params["bn2_v"] + eps) * params["bn2_g"] + params["bn2_b"]
    h = jnp.maximum(h, 0.0)
    logits = h @ params["w3"].T + params["b3"]
    l1 = (
        jnp.sum(jnp.abs(params["w1"]))
        + jnp.sum(jnp.abs(params["w2"]))
        + jnp.sum(jnp.abs(params["w3"]))
        + jnp.sum(jnp.abs(params["bn1_g"]))
        + jnp.sum(jnp.abs(params["bn2_g"]))
    )
    return logits, l1


if __name__ == "__main__":
    B, input_size, num_classes = 8, 32, 4

    key = jax.random.PRNGKey(0)
    k_x, k_p = jax.random.split(key)
    x = jax.random.normal(k_x, (B, input_size), jnp.float32)
    params = init_params(k_p, input_size, num_classes)

    logits, l1_reg = jax.block_until_ready(malnutrition_forward(x, params))

    ref_logits, ref_l1 = reference_forward(x, params)
    assert logits.shape == (B, num_classes)
    assert jnp.allclose(logits, ref_logits, atol=1e-4, rtol=1e-4)
    assert jnp.allclose(l1_reg, ref_l1, atol=1e-3, rtol=1e-4)

    print("KERNEL_OK")
</pallas_src>

<mosaic_0001>
module attributes {stable_mosaic.version = 11 : i64} {
  func.func @malnutrition_kernel(%arg0: i32, %arg1: memref<8x32xf32, #tpu.memory_space<vmem>>, %arg2: memref<32x256xf32, #tpu.memory_space<vmem>>, %arg3: memref<1x256xf32, #tpu.memory_space<vmem>>, %arg4: memref<256x128xf32, #tpu.memory_space<vmem>>, %arg5: memref<1x128xf32, #tpu.memory_space<vmem>>, %arg6: memref<128x4xf32, #tpu.memory_space<vmem>>, %arg7: memref<1x4xf32, #tpu.memory_space<vmem>>, %arg8: memref<8x4xf32, #tpu.memory_space<vmem>>) attributes {dimension_semantics = [#tpu.dimension_semantics<parallel>], iteration_bounds = array<i64: 1>, scalar_prefetch = 0 : i64, scratch_operands = 0 : i64, tpu.core_type = #tpu.core_type<tc>, window_params = [{transform_indices = @transform_0, window_bounds = array<i64: 8, 32>}, {pipeline_mode = #tpu.pipeline_mode<synchronous>, transform_indices = @transform_1, window_bounds = array<i64: 32, 256>}, {pipeline_mode = #tpu.pipeline_mode<synchronous>, transform_indices = @transform_2, window_bounds = array<i64: 1, 256>}, {pipeline_mode = #tpu.pipeline_mode<synchronous>, transform_indices = @transform_3, window_bounds = array<i64: 256, 128>}, {pipeline_mode = #tpu.pipeline_mode<synchronous>, transform_indices = @transform_4, window_bounds = array<i64: 1, 128>}, {pipeline_mode = #tpu.pipeline_mode<synchronous>, transform_indices = @transform_5, window_bounds = array<i64: 128, 4>}, {pipeline_mode = #tpu.pipeline_mode<synchronous>, transform_indices = @transform_6, window_bounds = array<i64: 1, 4>}, {transform_indices = @transform_7, window_bounds = array<i64: 8, 4>}]} {
    %c0 = arith.constant 0 : index
    %c0_0 = arith.constant 0 : index
    %0 = vector.load %arg1[%c0, %c0_0] : memref<8x32xf32, #tpu.memory_space<vmem>>, vector<8x32xf32>
    %c0_1 = arith.constant 0 : index
    %c0_2 = arith.constant 0 : index
    %1 = vector.load %arg2[%c0_1, %c0_2] : memref<32x256xf32, #tpu.memory_space<vmem>>, vector<32x256xf32>
    %cst = arith.constant dense<0.000000e+00> : vector<8x256xf32>
    %2 = tpu.matmul %0, %1, %cst {dimension_numbers = #tpu.dot_dimension_numbers<[1], [0], [0], [1], [0, 0, 1, 1], [], []>} : vector<8x32xf32>, vector<32x256xf32>, vector<8x256xf32> -> vector<8x256xf32>
    %c0_3 = arith.constant 0 : index
    %c0_4 = arith.constant 0 : index
    %3 = vector.load %arg3[%c0_3, %c0_4] : memref<1x256xf32, #tpu.memory_space<vmem>>, vector<1x256xf32>
    %4 = vector.broadcast %3 : vector<1x256xf32> to vector<8x256xf32>
    %5 = arith.addf %2, %4 : vector<8x256xf32>
    %cst_5 = arith.constant 0.000000e+00 : f32
    %6 = vector.broadcast %cst_5 : f32 to vector<8x256xf32>
    %7 = arith.maximumf %5, %6 : vector<8x256xf32>
    %c0_6 = arith.constant 0 : index
    %c0_7 = arith.constant 0 : index
    %8 = vector.load %arg4[%c0_6, %c0_7] : memref<256x128xf32, #tpu.memory_space<vmem>>, vector<256x128xf32>
    %cst_8 = arith.constant dense<0.000000e+00> : vector<8x128xf32>
    %9 = tpu.matmul %7, %8, %cst_8 {dimension_numbers = #tpu.dot_dimension_numbers<[1], [0], [0], [1], [0, 0, 1, 1], [], []>} : vector<8x256xf32>, vector<256x128xf32>, vector<8x128xf32> -> vector<8x128xf32>
    %c0_9 = arith.constant 0 : index
    %c0_10 = arith.constant 0 : index
    %10 = vector.load %arg5[%c0_9, %c0_10] : memref<1x128xf32, #tpu.memory_space<vmem>>, vector<1x128xf32>
    %11 = vector.broadcast %10 : vector<1x128xf32> to vector<8x128xf32>
    %12 = arith.addf %9, %11 : vector<8x128xf32>
    %cst_11 = arith.constant 0.000000e+00 : f32
    %13 = vector.broadcast %cst_11 : f32 to vector<8x128xf32>
    %14 = arith.maximumf %12, %13 : vector<8x128xf32>
    %c0_12 = arith.constant 0 : index
    %c0_13 = arith.constant 0 : index
    %15 = vector.load %arg6[%c0_12, %c0_13] : memref<128x4xf32, #tpu.memory_space<vmem>>, vector<128x4xf32>
    %cst_14 = arith.constant dense<0.000000e+00> : vector<8x4xf32>
    %16 = tpu.matmul %14, %15, %cst_14 {dimension_numbers = #tpu.dot_dimension_numbers<[1], [0], [0], [1], [0, 0, 1, 1], [], []>} : vector<8x128xf32>, vector<128x4xf32>, vector<8x4xf32> -> vector<8x4xf32>
    %c0_15 = arith.constant 0 : index
    %c0_16 = arith.constant 0 : index
    %17 = vector.load %arg7[%c0_15, %c0_16] : memref<1x4xf32, #tpu.memory_space<vmem>>, vector<1x4xf32>
    %18 = vector.broadcast %17 : vector<1x4xf32> to vector<8x4xf32>
    %19 = arith.addf %16, %18 : vector<8x4xf32>
    %c0_17 = arith.constant 0 : index
    %c0_18 = arith.constant 0 : index
    %20 = vector.load %arg8[%c0_17, %c0_18] : memref<8x4xf32, #tpu.memory_space<vmem>>, vector<8x4xf32>
    tpu.vector_store %arg8[%c0_17, %c0_18], %19 {strides = array<i32>} : memref<8x4xf32, #tpu.memory_space<vmem>>, vector<8x4xf32>,
    return
  }
  func.func @transform_0(%arg0: i32) -> (i32, i32) {
    %c0_i32 = arith.constant 0 : i32
    %c0_i32_0 = arith.constant 0 : i32
    return %arg0, %c0_i32 : i32, i32
  }
  func.func @transform_1(%arg0: i32) -> (i32, i32) {
    %c0_i32 = arith.constant 0 : i32
    %c0_i32_0 = arith.constant 0 : i32
    %c0_i32_1 = arith.constant 0 : i32
    return %c0_i32, %c0_i32_0 : i32, i32
  }
  func.func @transform_2(%arg0: i32) -> (i32, i32) {
    %c0_i32 = arith.constant 0 : i32
    %c0_i32_0 = arith.constant 0 : i32
    %c0_i32_1 = arith.constant 0 : i32
    return %c0_i32, %c0_i32_0 : i32, i32
  }
  func.func @transform_3(%arg0: i32) -> (i32, i32) {
    %c0_i32 = arith.constant 0 : i32
    %c0_i32_0 = arith.constant 0 : i32
    %c0_i32_1 = arith.constant 0 : i32
    return %c0_i32, %c0_i32_0 : i32, i32
  }
  func.func @transform_4(%arg0: i32) -> (i32, i32) {
    %c0_i32 = arith.constant 0 : i32
    %c0_i32_0 = arith.constant 0 : i32
    %c0_i32_1 = arith.constant 0 : i32
    return %c0_i32, %c0_i32_0 : i32, i32
  }
  func.func @transform_5(%arg0: i32) -> (i32, i32) {
    %c0_i32 = arith.constant 0 : i32
    %c0_i32_0 = arith.constant 0 : i32
    %c0_i32_1 = arith.constant 0 : i32
    return %c0_i32, %c0_i32_0 : i32, i32
  }
  func.func @transform_6(%arg0: i32) -> (i32, i32) {
    %c0_i32 = arith.constant 0 : i32
    %c0_i32_0 = arith.constant 0 : i32
    %c0_i32_1 = arith.constant 0 : i32
    return %c0_i32, %c0_i32_0 : i32, i32
  }
  func.func @transform_7(%arg0: i32) -> (i32, i32) {
    %c0_i32 = arith.constant 0 : i32
    %c0_i32_0 = arith.constant 0 : i32
    return %arg0, %c0_i32 : i32, i32
  }
}

</mosaic_0001>

<bundles_post_ra>
// kernel: tpu_custom_call.1
= control target key start
LH: loop header
LB: loop body
LE: loop exit
PB: predicated region body
PF: predicated region fallthrough
CT: control target
= control target key end

     0   :  { %12 = vsyncpa [#allocation3], 0  ;;  %s260_s27 = smov [#allocation2]   ;;  %s261_s29 = smov 128   ;;  %s395_s0 = inlined_call_operand.vmem [shape: f32[8,32], index: 0, kind: input, shape index: {}]   ;;  %s396_s1 = inlined_call_operand.vmem [shape: f32[32,256], index: 1, kind: input, shape index: {}]   ;;  %s397_s2 = inlined_call_operand.vmem [shape: f32[1,256], index: 2, kind: input, shape index: {}]   ;;  %s398_s3 = inlined_call_operand.hbm [shape: f32[256,128], index: 3, kind: input, shape index: {}]   ;;  %s399_s4 = inlined_call_operand.vmem [shape: f32[1,128], index: 4, kind: input, shape index: {}]   ;;  %s400_s5 = inlined_call_operand.vmem [shape: f32[128,4], index: 5, kind: input, shape index: {}]   ;;  %s401_s6 = inlined_call_operand.vmem [shape: f32[1,4], index: 6, kind: input, shape index: {}]   ;;  %s402_s7 = inlined_call_operand.vmem [shape: f32[8,4], index: 7, kind: output, shape index: {}]  }
   0x1   :  { %s23_s26 = sshll.u32 %s398_s3, 4  ;;  %s25_s28 = sshll.u32 %s260_s27, 4  ;;  %s24_s26 = int_to_ptr.hbm [resolvable:$true] %s23_s26  ;;  %s26_s28 = int_to_ptr.vmem [resolvable:$true] %s25_s28 }
   0x2   :  { %s262_s30 = smov 8  }
   0x3   :  { %31 = dma.hbm_to_vmem [thread:$0]  %s24_s26, 4096, %s26_s28, [#allocation3], %s261_s29, %s261_s29, %s262_s30  }
   0x4   :  { %258 = dma.done.wait [#allocation3], 4096  }
   0x5   :  { %259 = vsyncadd [#allocation3], 4294963200  ;;  %v49_v0 = vld [vmem:[%s396_s1 + $0x30] sm:$0xff]  ;;  %v47_v1 = vld [vmem:[%s396_s1 + $0x20] sm:$0xff]  ;;  %vm57_vm0 = vcmask 261120   ;;  %vm220_vm1 = vcmask 31744  }
   0x6   :  { %73 = vmatpush.msra.mxu1 %v49_v0  ;;  %v45_v2 = vld [vmem:[%s396_s1 + $0x10] sm:$0xff]  ;;  %v118_v3 = vld [vmem:[#allocation2 + $0x78] sm:$0xff]  ;;  %v43_v5 = vld [vmem:[%s396_s1] sm:$0xff] }
   0x7   :  { %v117_v4 = vld [vmem:[#allocation2 + $0x70] sm:$0xff]  ;;  %139 = vmatpush.msra.mxu2 %v118_v3  ;;  %v134_v6 = vld [vmem:[#allocation2 + $0xf8] sm:$0xff]  ;;  %v42_v7 = vld [vmem:[%s395_s0] sm:$0xff] }
   0x8   :  { %74 = vmatpush.msra.mxu1 %v47_v1  ;;  %v116_v8 = vld [vmem:[#allocation2 + $0x68] sm:$0xff]  ;;  %159 = vmatpush.msra.mxu3 %v134_v6  ;;  %v133_v9 = vld [vmem:[#allocation2 + $0xf0] sm:$0xff]  ;;  %v50_v10 = vld [vmem:[%s396_s1 + $0x38] sm:$0xff] }
   0x9   :  { %140 = vmatpush.msra.mxu2 %v117_v4  ;;  %v132_v11 = vld [vmem:[#allocation2 + $0xe8] sm:$0xff]  ;;  %v115_v12 = vld [vmem:[#allocation2 + $0x60] sm:$0xff]  ;;  %v114_v15 = vld [vmem:[#allocation2 + $0x58] sm:$0xff] }
   0xa   :  { %75 = vmatpush.msra.mxu1 %v45_v2  ;;  %160 = vmatpush.msra.mxu3 %v133_v9  ;;  %v48_v13 = vld [vmem:[%s396_s1 + $0x28] sm:$0xff]  ;;  %v131_v14 = vld [vmem:[#allocation2 + $0xe0] sm:$0xff]  ;;  %v46_v16 = vld [vmem:[%s396_s1 + $0x18] sm:$0xff] }
   0xb   :  { %141 = vmatpush.msra.mxu2 %v116_v8  ;;  %v130_v17 = vld [vmem:[#allocation2 + $0xd8] sm:$0xff]  ;;  %v113_v18 = vld [vmem:[#allocation2 + $0x50] sm:$0xff]  ;;  %v44_v19 = vld [vmem:[%s396_s1 + $0x8] sm:$0xff] }
   0xc   :  { %76 = vmatpush.msra.mxu1 %v43_v5  ;;  %161 = vmatpush.msra.mxu3 %v132_v11  ;;  %v129_v20 = vld [vmem:[#allocation2 + $0xd0] sm:$0xff]  ;;  %v112_v21 = vld [vmem:[#allocation2 + $0x48] sm:$0xff]  ;;  %v111_v23 = vld [vmem:[#allocation2 + $0x40] sm:$0xff] }
   0xd   :  { %227 = vmatmul.msk.f32.vlgmr.msra.gmra.mxu1 %vm57_vm0, %v42_v7  ;;  %142 = vmatpush.msra.mxu2 %v115_v12  ;;  %v128_v22 = vld [vmem:[#allocation2 + $0xc8] sm:$0xff]  ;;  %v127_v24 = vld [vmem:[#allocation2 + $0xc0] sm:$0xff]  ;;  %v110_v25 = vld [vmem:[#allocation2 + $0x38] sm:$0xff] }
   0xe   :  { %93 = vmatpush.msrb.mxu1 %v50_v10  ;;  %162 = vmatpush.msra.mxu3 %v131_v14  ;;  %v126_v26 = vld [vmem:[#allocation2 + $0xb8] sm:$0xff]  ;;  %v109_v27 = vld [vmem:[#allocation2 + $0x30] sm:$0xff]  ;;  %v108_v28 = vld [vmem:[#allocation2 + $0x28] sm:$0xff] }
   0xf   :  { %143 = vmatpush.msra.mxu2 %v114_v15  ;;  %v107_v29 = vld [vmem:[#allocation2 + $0x20] sm:$0xff]  ;;  %v106_v30 = vld [vmem:[#allocation2 + $0x18] sm:$0xff]  ;;  %v105_v31 = vld [vmem:[#allocation2 + $0x10] sm:$0xff] }
  0x10   :  { %94 = vmatpush.msrb.mxu1 %v48_v13  ;;  %163 = vmatpush.msra.mxu3 %v130_v17  ;;  %v125_v32 = vld [vmem:[#allocation2 + $0xb0] sm:$0xff]  ;;  %v104_v33 = vld [vmem:[#allocation2 + $0x8] sm:$0xff]  ;;  %v103_v35 = vld [vmem:[#allocation2] sm:$0xff] }
  0x11   :  { %144 = vmatpush.msra.mxu2 %v113_v18  ;;  %v124_v34 = vld [vmem:[#allocation2 + $0xa8] sm:$0xff]  ;;  %v123_v36 = vld [vmem:[#allocation2 + $0xa0] sm:$0xff]  ;;  %v122_v37 = vld [vmem:[#allocation2 + $0x98] sm:$0xff] }
  0x12   :  { %95 = vmatpush.msrb.mxu1 %v46_v16  ;;  %164 = vmatpush.msra.mxu3 %v129_v20  ;;  %v121_v38 = vld [vmem:[#allocation2 + $0x90] sm:$0xff]  ;;  %v120_v39 = vld [vmem:[#allocation2 + $0x88] sm:$0xff]  ;;  %v119_v40 = vld [vmem:[#allocation2 + $0x80] sm:$0xff] }
  0x13   :  { %145 = vmatpush.msra.mxu2 %v112_v21  ;;  %v195_v41 = vld [vmem:[%s400_s5 + $0x78] sm:$0xff]  ;;  %v194_v42 = vld [vmem:[%s400_s5 + $0x70] sm:$0xff]  ;;  %v193_v43 = vld [vmem:[%s400_s5 + $0x68] sm:$0xff] }
  0x14   :  { %96 = vmatpush.msrb.mxu1 %v44_v19  ;;  %165 = vmatpush.msra.mxu3 %v128_v22  ;;  %v192_v44 = vld [vmem:[%s400_s5 + $0x60] sm:$0xff]  ;;  %v191_v45 = vld [vmem:[%s400_s5 + $0x58] sm:$0xff]  ;;  %v190_v46 = vld [vmem:[%s400_s5 + $0x50] sm:$0xff] }
  0x15   :  { %228 = vmatmul.msk.f32.vlgmr.msrb.gmra.mxu1 %vm57_vm0, %v42_v7  ;;  %146 = vmatpush.msra.mxu2 %v111_v23  ;;  %v189_v47 = vld [vmem:[%s400_s5 + $0x48] sm:$0xff]  ;;  %v188_v48 = vld [vmem:[%s400_s5 + $0x40] sm:$0xff]  ;;  %v187_v50 = vld [vmem:[%s400_s5 + $0x38] sm:$0xff] }
  0x16   :  { %166 = vmatpush.msra.mxu3 %v127_v24  ;;  %200 = vmatpush.msra.mxu0 %v195_v41  ;;  %v51_v49 = vld [vmem:[%s397_s2] sm:$0x3]  ;;  %v186_v59 = vld [vmem:[%s400_s5 + $0x30] sm:$0xff]  ;;  %v185_v60 = vld [vmem:[%s400_s5 + $0x28] sm:$0xff] }
  0x17   :  { %147 = vmatpush.msra.mxu2 %v110_v25  ;;  %v53_v51 = vperm.slane %v51_v49, 0  ;;  %v54_v55 = vperm.slane %v51_v49, 1  ;;  %v184_v61 = vld [vmem:[%s400_s5 + $0x20] sm:$0xff]  ;;  %v183_v62 = vld [vmem:[%s400_s5 + $0x18] sm:$0xff]  ;;  %v182_v63 = vld [vmem:[%s400_s5 + $0x10] sm:$0xff] }
  0x18   :  { %167 = vmatpush.msra.mxu3 %v126_v26  ;;  %201 = vmatpush.msra.mxu0 %v194_v42  ;;  %v181_v0 = vld [vmem:[%s400_s5 + $0x8] sm:$0xff]  ;;  %v180_v1 = vld [vmem:[%s400_s5] sm:$0xff] }
  0x19   :  { %148 = vmatpush.msra.mxu2 %v109_v27  ;;  %v232_v2 = vld [vmem:[%s399_s4] ss:$0 sm:$0xff] }
  0x1a   :  { %168 = vmatpush.msra.mxu3 %v125_v32  ;;  %202 = vmatpush.msra.mxu0 %v193_v43  ;;  %v233_v8 = vld [vmem:[%s401_s6] ss:$0 sm:$0xff] }
  0x1b   :  { %149 = vmatpush.msra.mxu2 %v108_v28 }
  0x1c   :  { %169 = vmatpush.msra.mxu3 %v124_v34  ;;  %203 = vmatpush.msra.mxu0 %v192_v44 }
  0x1d   :  { %150 = vmatpush.msra.mxu2 %v107_v29 }
  0x1e   :  { %170 = vmatpush.msra.mxu3 %v123_v36  ;;  %204 = vmatpush.msra.mxu0 %v191_v45 }
  0x1f   :  { %151 = vmatpush.msra.mxu2 %v106_v30 }
  0x20   :  { %171 = vmatpush.msra.mxu3 %v122_v37  ;;  %205 = vmatpush.msra.mxu0 %v190_v46 }
  0x21   :  { %152 = vmatpush.msra.mxu2 %v105_v31 }
  0x22   :  { %172 = vmatpush.msra.mxu3 %v121_v38  ;;  %206 = vmatpush.msra.mxu0 %v189_v47 }
  0x23   :  { %153 = vmatpush.msra.mxu2 %v104_v33 }
  0x24   :  { %173 = vmatpush.msra.mxu3 %v120_v39  ;;  %207 = vmatpush.msra.mxu0 %v188_v48 }
  0x25   :  { %154 = vmatpush.msra.mxu2 %v103_v35 }
  0x26   :  { %174 = vmatpush.msra.mxu3 %v119_v40  ;;  %208 = vmatpush.msra.mxu0 %v187_v50 }
  0x28   :  { %209 = vmatpush.msra.mxu0 %v186_v59 }
  0x2a   :  { %210 = vmatpush.msra.mxu0 %v185_v60 }
  0x2c   :  { %211 = vmatpush.msra.mxu0 %v184_v61 }
  0x2e   :  { %212 = vmatpush.msra.mxu0 %v183_v62 }
  0x30   :  { %213 = vmatpush.msra.mxu0 %v182_v63 }
  0x32   :  { %214 = vmatpush.msra.mxu0 %v181_v0 }
  0x34   :  { %215 = vmatpush.msra.mxu0 %v180_v1 }
  0x8a   :  { %v78_v52 = vpop.f32.mrf.mxu1 }
  0x8b   :  { %v79_v53 = vadd.f32 %v78_v52, %v53_v51 }
  0x8d   :  { %v101_v54 = vmax.f32 %v79_v53, 0.0 }
  0x8f   :  { %155 = vmatmul.f32.vlgmr.msra.gmra.mxu2 %v101_v54 }
  0x92   :  { %v98_v56 = vpop.f32.mrf.mxu1 }
  0x93   :  { %v99_v57 = vadd.f32 %v98_v56, %v54_v55 }
  0x95   :  { %v102_v58 = vmax.f32 %v99_v57, 0.0 }
  0x97   :  { %175 = vmatmul.f32.vlgmr.msra.gmra.mxu3 %v102_v58 }
 0x112   :  { %v156_v3 = vpop.f32.mrf.mxu2 }
 0x113   :  { %v157_v4 = vadd.f32 %v232_v2, %v156_v3 }
 0x11a   :  { %v176_v5 = vpop.f32.mrf.mxu3 }
 0x11b   :  { %v177_v6 = vadd.f32 %v176_v5, %v157_v4 }
 0x11d   :  { %v179_v7 = vmax.f32 %v177_v6, 0.0 }
 0x11f   :  { %216 = vmatmul.f32.vlgmr.msra.gmra.mxu0 %v179_v7 }
 0x19c   :  { %v217_v9 = vpop.f32.mrf.mxu0 }
 0x19d   :  { %v218_v10 = vadd.f32 %v233_v8, %v217_v9 }
 0x19f   :  { %221 = vst.msk [vmem:[%s402_s7] sm:$0xff] %vm220_vm1, %v218_v10 }
 0x1a0   :  { %226 = vsyncpa [#allocation3], 1 }

</bundles_post_ra>
